<compile_context>
chip_gen: v7x
topology: tpu7x:2x2x1
jax: 0.10.0
libtpu: 0.0.40
codegen_flags: <defaults>
</compile_context>

<pallas_src>
import jax
import jax.numpy as jnp
from jax.experimental import pallas as pl
from jax.experimental.pallas import tpu as pltpu

SUBLANE = 8  # f32 sublane count


def _round_up(n, m):
    return (n + m - 1) // m * m


def mlp_kernel(x_ref, w1_ref, b1_ref, w2_ref, b2_ref, w3_ref, b3_ref, o_ref):
    # One batch tile per grid step; weights/biases are VMEM-resident across steps.
    x = x_ref[...]

    h1 = jnp.dot(x, w1_ref[...], preferred_element_type=jnp.float32) + b1_ref[...]
    h1 = jnp.maximum(h1, 0.0)

    h2 = (jnp.dot(h1.astype(w2_ref.dtype), w2_ref[...],
                  preferred_element_type=jnp.float32) + b2_ref[...])
    h2 = jnp.maximum(h2, 0.0)

    out = (jnp.dot(h2.astype(w3_ref.dtype), w3_ref[...],
                   preferred_element_type=jnp.float32) + b3_ref[...])
    o_ref[...] = out.astype(o_ref.dtype)


def _pick_batch_tiling(B, max_batch_tile):
    """Return (tile_rows, n_grid_steps); tile_rows is a multiple of 8."""
    max_tb = _round_up(max(int(max_batch_tile), SUBLANE), SUBLANE)
    b8 = _round_up(B, SUBLANE)
    if b8 <= max_tb:
        # Small batch: single tile; not worth splitting across cores.
        return b8, 1
    n_steps = pl.cdiv(b8, max_tb)
    # Even step count -> balanced split across both v7x TensorCores.
    if n_steps % 2:
        n_steps += 1
    tb = _round_up(pl.cdiv(b8, n_steps), SUBLANE)
    return tb, n_steps


def mlp_forward(x, w1, b1, w2, b2, w3, b3, *, max_batch_tile=1024):
    """y = relu(relu(x @ w1 + b1) @ w2 + b2) @ w3 + b3  (weights stored (in, out))."""
    B, in_f = x.shape
    h1f, h2f, out_f = w1.shape[1], w2.shape[1], w3.shape[1]

    TB, n_steps = _pick_batch_tiling(B, max_batch_tile)
    B_P = TB * n_steps

    # Only padding left: batch rows up to a whole number of tiles (no-op when aligned).
    xp = x if B_P == B else jnp.pad(x, ((0, B_P - B), (0, 0)))

    x_item = jnp.dtype(x.dtype).itemsize
    param_bytes = sum(int(a.size) * jnp.dtype(a.dtype).itemsize
                      for a in (w1, b1, w2, b2, w3, b3))
    cost = pl.CostEstimate(
        flops=2 * B_P * (in_f * h1f + h1f * h2f + h2f * out_f),
        transcendentals=0,
        bytes_accessed=B_P * (in_f + out_f) * x_item + param_bytes,
    )

    out = pl.pallas_call(
        mlp_kernel,
        out_shape=jax.ShapeDtypeStruct((B_P, out_f), x.dtype),
        grid=(n_steps,),
        in_specs=[
            pl.BlockSpec((TB, in_f), lambda i: (i, 0)),      # x: batch-tiled, unpadded lanes
            pl.BlockSpec((in_f, h1f), lambda i: (0, 0)),     # weights/biases resident in VMEM
            pl.BlockSpec((1, h1f), lambda i: (0, 0)),
            pl.BlockSpec((h1f, h2f), lambda i: (0, 0)),
            pl.BlockSpec((1, h2f), lambda i: (0, 0)),
            pl.BlockSpec((h2f, out_f), lambda i: (0, 0)),
            pl.BlockSpec((1, out_f), lambda i: (0, 0)),
        ],
        out_specs=pl.BlockSpec((TB, out_f), lambda i: (i, 0)),
        compiler_params=pltpu.CompilerParams(
            dimension_semantics=("parallel",)),
        cost_estimate=cost,
    )(xp, w1, b1, w2, b2, w3, b3)

    return out if B_P == B else out[:B]


def init_params(key, in_features=4, h1=8, h2=8, out_features=2):
    # Deterministic init mimicking nn.Linear's U(-1/sqrt(fan_in), 1/sqrt(fan_in)).
    ks = jax.random.split(key, 6)

    def lin(kw, kb, fan_in, fan_out):
        bound = 1.0 / jnp.sqrt(fan_in)
        # stored as (in, out) -> kernel computes x @ W (== x @ W_pt.T in PyTorch)
        w = jax.random.uniform(kw, (fan_in, fan_out), jnp.float32, -bound, bound)
        b = jax.random.uniform(kb, (1, fan_out), jnp.float32, -bound, bound)
        return w, b

    w1, b1 = lin(ks[0], ks[1], in_features, h1)
    w2, b2 = lin(ks[2], ks[3], h1, h2)
    w3, b3 = lin(ks[4], ks[5], h2, out_features)
    return w1, b1, w2, b2, w3, b3


def reference(x, w1, b1, w2, b2, w3, b3):
    h = jax.nn.relu(x @ w1 + b1)
    h = jax.nn.relu(h @ w2 + b2)
    return h @ w3 + b3


if __name__ == "__main__":
    key = jax.random.PRNGKey(0)
    kx, kp, kx2 = jax.random.split(key, 3)

    B, in_features, h1, h2, out_features = 8, 4, 8, 8, 2
    params = init_params(kp, in_features, h1, h2, out_features)

    # Small-shape check (matches the module's nominal sizes): grid=(1,), no padding.
    x = jax.random.normal(kx, (B, in_features), jnp.float32)
    out = jax.block_until_ready(mlp_forward(x, *params))
    ref = reference(x, *params)
    assert out.shape == (B, out_features), out.shape
    assert jnp.allclose(out, ref, atol=1e-5, rtol=1e-5), "mismatch vs reference (small)"

    # Larger batch to exercise a multi-step (even-length) grid and batch padding.
    x_big = jax.random.normal(kx2, (300, in_features), jnp.float32)
    out_big = jax.block_until_ready(mlp_forward(x_big, *params, max_batch_tile=128))
    ref_big = reference(x_big, *params)
    assert out_big.shape == (300, out_features), out_big.shape
    assert jnp.allclose(out_big, ref_big, atol=1e-5, rtol=1e-5), "mismatch vs reference (big)"

    print("KERNEL_OK")
</pallas_src>

<mosaic_0001>
module attributes {stable_mosaic.version = 11 : i64} {
  func.func @mlp_kernel(%arg0: i32, %arg1: memref<8x4xf32, #tpu.memory_space<vmem>>, %arg2: memref<4x8xf32, #tpu.memory_space<vmem>>, %arg3: memref<1x8xf32, #tpu.memory_space<vmem>>, %arg4: memref<8x8xf32, #tpu.memory_space<vmem>>, %arg5: memref<1x8xf32, #tpu.memory_space<vmem>>, %arg6: memref<8x2xf32, #tpu.memory_space<vmem>>, %arg7: memref<1x2xf32, #tpu.memory_space<vmem>>, %arg8: memref<8x2xf32, #tpu.memory_space<vmem>>) attributes {dimension_semantics = [#tpu.dimension_semantics<parallel>], iteration_bounds = array<i64: 1>, scalar_prefetch = 0 : i64, scratch_operands = 0 : i64, tpu.core_type = #tpu.core_type<tc>, window_params = [{transform_indices = @transform_0, window_bounds = array<i64: 8, 4>}, {pipeline_mode = #tpu.pipeline_mode<synchronous>, transform_indices = @transform_1, window_bounds = array<i64: 4, 8>}, {pipeline_mode = #tpu.pipeline_mode<synchronous>, transform_indices = @transform_2, window_bounds = array<i64: 1, 8>}, {pipeline_mode = #tpu.pipeline_mode<synchronous>, transform_indices = @transform_3, window_bounds = array<i64: 8, 8>}, {pipeline_mode = #tpu.pipeline_mode<synchronous>, transform_indices = @transform_4, window_bounds = array<i64: 1, 8>}, {pipeline_mode = #tpu.pipeline_mode<synchronous>, transform_indices = @transform_5, window_bounds = array<i64: 8, 2>}, {pipeline_mode = #tpu.pipeline_mode<synchronous>, transform_indices = @transform_6, window_bounds = array<i64: 1, 2>}, {transform_indices = @transform_7, window_bounds = array<i64: 8, 2>}]} {
    %c0 = arith.constant 0 : index
    %c0_0 = arith.constant 0 : index
    %0 = vector.load %arg1[%c0, %c0_0] : memref<8x4xf32, #tpu.memory_space<vmem>>, vector<8x4xf32>
    %c0_1 = arith.constant 0 : index
    %c0_2 = arith.constant 0 : index
    %1 = vector.load %arg2[%c0_1, %c0_2] : memref<4x8xf32, #tpu.memory_space<vmem>>, vector<4x8xf32>
    %cst = arith.constant dense<0.000000e+00> : vector<8x8xf32>
    %2 = tpu.matmul %0, %1, %cst {dimension_numbers = #tpu.dot_dimension_numbers<[1], [0], [0], [1], [0, 0, 1, 1], [], []>} : vector<8x4xf32>, vector<4x8xf32>, vector<8x8xf32> -> vector<8x8xf32>
    %c0_3 = arith.constant 0 : index
    %c0_4 = arith.constant 0 : index
    %3 = vector.load %arg3[%c0_3, %c0_4] : memref<1x8xf32, #tpu.memory_space<vmem>>, vector<1x8xf32>
    %4 = vector.broadcast %3 : vector<1x8xf32> to vector<8x8xf32>
    %5 = arith.addf %2, %4 : vector<8x8xf32>
    %cst_5 = arith.constant 0.000000e+00 : f32
    %6 = vector.broadcast %cst_5 : f32 to vector<8x8xf32>
    %7 = arith.maximumf %5, %6 : vector<8x8xf32>
    %c0_6 = arith.constant 0 : index
    %c0_7 = arith.constant 0 : index
    %8 = vector.load %arg4[%c0_6, %c0_7] : memref<8x8xf32, #tpu.memory_space<vmem>>, vector<8x8xf32>
    %cst_8 = arith.constant dense<0.000000e+00> : vector<8x8xf32>
    %9 = tpu.matmul %7, %8, %cst_8 {dimension_numbers = #tpu.dot_dimension_numbers<[1], [0], [0], [1], [0, 0, 1, 1], [], []>} : vector<8x8xf32>, vector<8x8xf32>, vector<8x8xf32> -> vector<8x8xf32>
    %c0_9 = arith.constant 0 : index
    %c0_10 = arith.constant 0 : index
    %10 = vector.load %arg5[%c0_9, %c0_10] : memref<1x8xf32, #tpu.memory_space<vmem>>, vector<1x8xf32>
    %11 = vector.broadcast %10 : vector<1x8xf32> to vector<8x8xf32>
    %12 = arith.addf %9, %11 : vector<8x8xf32>
    %cst_11 = arith.constant 0.000000e+00 : f32
    %13 = vector.broadcast %cst_11 : f32 to vector<8x8xf32>
    %14 = arith.maximumf %12, %13 : vector<8x8xf32>
    %c0_12 = arith.constant 0 : index
    %c0_13 = arith.constant 0 : index
    %15 = vector.load %arg6[%c0_12, %c0_13] : memref<8x2xf32, #tpu.memory_space<vmem>>, vector<8x2xf32>
    %cst_14 = arith.constant dense<0.000000e+00> : vector<8x2xf32>
    %16 = tpu.matmul %14, %15, %cst_14 {dimension_numbers = #tpu.dot_dimension_numbers<[1], [0], [0], [1], [0, 0, 1, 1], [], []>} : vector<8x8xf32>, vector<8x2xf32>, vector<8x2xf32> -> vector<8x2xf32>
    %c0_15 = arith.constant 0 : index
    %c0_16 = arith.constant 0 : index
    %17 = vector.load %arg7[%c0_15, %c0_16] : memref<1x2xf32, #tpu.memory_space<vmem>>, vector<1x2xf32>
    %18 = vector.broadcast %17 : vector<1x2xf32> to vector<8x2xf32>
    %19 = arith.addf %16, %18 : vector<8x2xf32>
    %c0_17 = arith.constant 0 : index
    %c0_18 = arith.constant 0 : index
    %20 = vector.load %arg8[%c0_17, %c0_18] : memref<8x2xf32, #tpu.memory_space<vmem>>, vector<8x2xf32>
    tpu.vector_store %arg8[%c0_17, %c0_18], %19 {strides = array<i32>} : memref<8x2xf32, #tpu.memory_space<vmem>>, vector<8x2xf32>,
    return
  }
  func.func @transform_0(%arg0: i32) -> (i32, i32) {
    %c0_i32 = arith.constant 0 : i32
    %c0_i32_0 = arith.constant 0 : i32
    return %arg0, %c0_i32 : i32, i32
  }
  func.func @transform_1(%arg0: i32) -> (i32, i32) {
    %c0_i32 = arith.constant 0 : i32
    %c0_i32_0 = arith.constant 0 : i32
    %c0_i32_1 = arith.constant 0 : i32
    return %c0_i32, %c0_i32_0 : i32, i32
  }
  func.func @transform_2(%arg0: i32) -> (i32, i32) {
    %c0_i32 = arith.constant 0 : i32
    %c0_i32_0 = arith.constant 0 : i32
    %c0_i32_1 = arith.constant 0 : i32
    return %c0_i32, %c0_i32_0 : i32, i32
  }
  func.func @transform_3(%arg0: i32) -> (i32, i32) {
    %c0_i32 = arith.constant 0 : i32
    %c0_i32_0 = arith.constant 0 : i32
    %c0_i32_1 = arith.constant 0 : i32
    return %c0_i32, %c0_i32_0 : i32, i32
  }
  func.func @transform_4(%arg0: i32) -> (i32, i32) {
    %c0_i32 = arith.constant 0 : i32
    %c0_i32_0 = arith.constant 0 : i32
    %c0_i32_1 = arith.constant 0 : i32
    return %c0_i32, %c0_i32_0 : i32, i32
  }
  func.func @transform_5(%arg0: i32) -> (i32, i32) {
    %c0_i32 = arith.constant 0 : i32
    %c0_i32_0 = arith.constant 0 : i32
    %c0_i32_1 = arith.constant 0 : i32
    return %c0_i32, %c0_i32_0 : i32, i32
  }
  func.func @transform_6(%arg0: i32) -> (i32, i32) {
    %c0_i32 = arith.constant 0 : i32
    %c0_i32_0 = arith.constant 0 : i32
    %c0_i32_1 = arith.constant 0 : i32
    return %c0_i32, %c0_i32_0 : i32, i32
  }
  func.func @transform_7(%arg0: i32) -> (i32, i32) {
    %c0_i32 = arith.constant 0 : i32
    %c0_i32_0 = arith.constant 0 : i32
    return %arg0, %c0_i32 : i32, i32
  }
}

</mosaic_0001>

<bundles_post_ra>
// kernel: tpu_custom_call.1
= control target key start
LH: loop header
LB: loop body
LE: loop exit
PB: predicated region body
PF: predicated region fallthrough
CT: control target
= control target key end

     0   :  { %vm39_vm0 = vcmask 1043456   ;;  %vm35_vm1 = vcmask 31744   ;;  %v314_v0 = vmov 0.0   ;;  %vm315_vm2 = vmmov 0   ;;  %s380_s1 = inlined_call_operand.vmem [shape: f32[4,8], index: 1, kind: input, shape index: {}]   ;;  %s381_s0 = inlined_call_operand.vmem [shape: f32[8,4], index: 0, kind: input, shape index: {}]   ;;  %s382_s3 = inlined_call_operand.vmem [shape: f32[8,8], index: 3, kind: input, shape index: {}]   ;;  %s383_s2 = inlined_call_operand.vmem [shape: f32[1,8], index: 2, kind: input, shape index: {}]   ;;  %s384_s5 = inlined_call_operand.vmem [shape: f32[8,2], index: 5, kind: input, shape index: {}]   ;;  %s385_s4 = inlined_call_operand.vmem [shape: f32[1,8], index: 4, kind: input, shape index: {}]   ;;  %s386_s6 = inlined_call_operand.vmem [shape: f32[1,2], index: 6, kind: input, shape index: {}]   ;;  %s387_s7 = inlined_call_operand.vmem [shape: f32[8,2], index: 7, kind: output, shape index: {}]  }
   0x1   :  { %297 = vmatprep.subr.mxu0 %v314_v0  ;;  %v27_v1 = vld [vmem:[%s380_s1] sm:$0xf]  ;;  %299 = vmatprep.mubr.msk.f32.mxu0 %vm315_vm2, %v314_v0  ;;  %vm122_vm3 = vcmask 64512   ;;  %vm278_vm4 = vcmask 15360  }
   0x2   :  { %v26_v2 = vld [vmem:[%s381_s0] sm:$0xff]  ;;  %298 = vmatpush3.msk.msra.mxu0 %vm39_vm0, %v27_v1  ;;  %302 = vmatprep.subr.mxu1 %v314_v0 }
   0x3   :  { %300 = vmatmul.mubr.msk.f32.vlgmr.msra.gmra.mrb[0].mxu0 %vm35_vm1, %v26_v2  ;;  %304 = vmatprep.mubr.msk.f32.mxu1 %vm315_vm2, %v314_v0  ;;  %v114_v3 = vld [vmem:[%s382_s3] sm:$0xff] }
   0x4   :  { %307 = vmatprep.subr.mxu0 %v314_v0  ;;  %309 = vmatprep.mubr.msk.f32.mxu0 %vm315_vm2, %v314_v0  ;;  %v284_v4 = vld [vmem:[%s383_s2] ss:$0 sm:$0xff] }
   0x5   :  { %303 = vmatpush3.msra.mxu1 %v114_v3  ;;  %v197_v9 = vld [vmem:[%s384_s5] sm:$0xff] }
   0x6   :  { %308 = vmatpush3.msra.mxu0 %v197_v9  ;;  %v287_v10 = vld [vmem:[%s385_s4] ss:$0 sm:$0xff] }
   0x7   :  { %v289_v15 = vld [vmem:[%s386_s6] ss:$0 sm:$0xff] }
  0xd6   :  { %v109_v5 = vpop.f32.mrb[0].mxu0 }
  0xd7   :  { %v110_v6 = vadd.f32 %v284_v4, %v109_v5  ;;  %v301_v7 = vpop.f32.mrb[1].mxu0 }
  0xd9   :  { %v113_v8 = vmax.f32 %v110_v6, 0.0 }
  0xdb   :  { %305 = vmatmul.mubr.msk.f32.vlgmr.msra.gmra.mrb[0].mxu1 %vm122_vm3, %v113_v8 }
 0x1ae   :  { %v192_v11 = vpop.f32.mrb[0].mxu1 }
 0x1af   :  { %v193_v12 = vadd.f32 %v287_v10, %v192_v11  ;;  %v306_v13 = vpop.f32.mrb[1].mxu1 }
 0x1b1   :  { %v196_v14 = vmax.f32 %v193_v12, 0.0 }
 0x1b3   :  { %310 = vmatmul.mubr.msk.f32.vlgmr.msra.gmra.mrb[2].mxu0 %vm122_vm3, %v196_v14 }
 0x286   :  { %v274_v16 = vpop.f32.mrb[2].mxu0 }
 0x287   :  { %v275_v17 = vadd.f32 %v289_v15, %v274_v16  ;;  %v311_v18 = vpop.f32.mrb[3].mxu0 }
 0x289   :  { %279 = vst.msk [vmem:[%s387_s7] sm:$0xff] %vm278_vm4, %v275_v17 }

</bundles_post_ra>
